<compile_context>
chip_gen: v5e
topology: v5e:2x2
jax: 0.10.0
libtpu: 0.0.40
codegen_flags: <defaults>
</compile_context>

<pallas_src>
import functools

import jax
import jax.numpy as jnp
from jax.experimental import pallas as pl
from jax.experimental.pallas import tpu as pltpu


def _row_nll(x_ref, m_ref, t_ref):
    """Per-row NLL of log_softmax(x + m) at the target class."""
    x = x_ref[...].astype(jnp.float32)                        # (TM, C)
    m = m_ref[...].astype(jnp.float32)                        # (1, C)
    logits = x + m                                            # x_m = x + m_list

    # Target logit via masked lane reduction straight from `logits`, so the
    # shifted tile below never needs to stay live for a later gather.
    tgt = t_ref[...]                                          # (TM, 1) int32
    col = jax.lax.broadcasted_iota(jnp.int32, logits.shape, 1)
    tgt_logit = jnp.sum(jnp.where(col == tgt, logits, 0.0),
                        axis=-1, keepdims=True)               # (TM, 1)

    row_max = jnp.max(logits, axis=-1, keepdims=True)         # (TM, 1)
    sum_exp = jnp.sum(jnp.exp(logits - row_max), axis=-1, keepdims=True)
    lse = row_max + jnp.log(sum_exp)                          # full logsumexp
    return lse - tgt_logit                                    # (TM, 1) NLL


def _write_partial(part_ref, num, den):
    """Write scalar (num, den) into lanes 0/1 of the (1, 8, 128) partial tile
    (lane-dense block -> unmasked vector store)."""
    sub = jax.lax.broadcasted_iota(jnp.int32, part_ref.shape, 1)
    lane = jax.lax.broadcasted_iota(jnp.int32, part_ref.shape, 2)
    sel_num = (sub == 0) & (lane == 0)
    sel_den = (sub == 0) & (lane == 1)
    part_ref[...] = jnp.where(sel_num, num, jnp.where(sel_den, den, 0.0))


def _dala_kernel_unweighted(x_ref, m_ref, t_ref, part_ref, *, n_rows, tile_rows):
    i = pl.program_id(0)
    nll = _row_nll(x_ref, m_ref, t_ref)                       # (TM, 1)

    row = i * tile_rows + jax.lax.broadcasted_iota(jnp.int32, nll.shape, 0)
    valid = row < n_rows                                      # mask ragged last tile

    num = jnp.sum(jnp.where(valid, nll, 0.0))
    den = jnp.sum(jnp.where(valid, 1.0, 0.0))                 # valid-row count
    _write_partial(part_ref, num, den)


def _dala_kernel_weighted(x_ref, m_ref, t_ref, w_ref, part_ref, *, n_rows, tile_rows):
    i = pl.program_id(0)
    nll = _row_nll(x_ref, m_ref, t_ref)                       # (TM, 1)
    w_row = w_ref[...].astype(jnp.float32)                    # (TM, 1) = weight[target]

    row = i * tile_rows + jax.lax.broadcasted_iota(jnp.int32, nll.shape, 0)
    valid = row < n_rows

    num = jnp.sum(jnp.where(valid, nll * w_row, 0.0))
    den = jnp.sum(jnp.where(valid, w_row, 0.0))
    _write_partial(part_ref, num, den)


def _vmem_capacity_bytes():
    try:
        return int(pltpu.get_tpu_info().vmem_capacity_bytes)
    except Exception:
        return 64 * 1024 * 1024  # conservative (v7x-sized per-TC VMEM)


def _round8_up(v):
    return max(8, ((int(v) + 7) // 8) * 8)


def _pick_tile_rows(n, c, vmem_bytes):
    """Row-tile size in f32-equivalent bytes (the kernel upcasts, and peak
    VMEM is ~ double-buffered input tiles + a few live (TM, C) f32 temps).
    Guarantees >= 2 tiles whenever N >= 16 so the 'parallel' batch axis can
    shard across v7x's two TensorCores."""
    big_part = vmem_bytes >= 96 * 1024 * 1024                 # v5e/v6e (128 MiB)
    budget_bytes = (8 if big_part else 2) * 1024 * 1024
    tm = budget_bytes // max(1, c * 4)                        # f32-equivalent
    tm = max(8, min(int(tm), 2048))
    tm = (tm // 8) * 8
    if tm >= n:
        if n >= 16:
            tm = _round8_up(-(-n // 2))                       # ~2 balanced tiles
        else:
            tm = n                                            # tiny batch: 1 full block
    return tm


def dala_loss(x, target, m_list, weight=None, *, tile_rows=None):
    """Pallas TPU implementation of DALA.forward(x, target).

    x: (N, C) float logits (f32 or bf16 — kept in input dtype through the
       pallas_call boundary), target: (N,) int class indices,
    m_list: (C,) or (1, C) float margins, weight: optional (C,) class weights.
    Returns scalar float32 loss (PyTorch 'mean' reduction semantics).

    Notes: no ignore_index support; out-of-range targets silently yield
    nll = lse; if all targets in a batch have zero class weight the result is
    inf/NaN (matches PyTorch's degenerate behavior).
    """
    N, C = x.shape
    m = jnp.asarray(m_list).reshape(1, C)
    t = jnp.asarray(target, jnp.int32).reshape(N, 1)

    vmem_bytes = _vmem_capacity_bytes()
    if tile_rows is None:
        tile_rows = _pick_tile_rows(N, C, vmem_bytes)
    tm = int(tile_rows)
    num_tiles = pl.cdiv(N, tm)

    itemsize = jnp.dtype(x.dtype).itemsize
    x_spec = pl.BlockSpec((tm, C), lambda i: (i, 0))
    m_spec = pl.BlockSpec((1, C), lambda i: (0, 0))           # resident margins
    t_spec = pl.BlockSpec((tm, 1), lambda i: (i, 0))
    part_spec = pl.BlockSpec((1, 8, 128), lambda i: (i, 0, 0))
    out_shape = jax.ShapeDtypeStruct((num_tiles, 8, 128), jnp.float32)

    cost = pl.CostEstimate(
        flops=int(6 * N * C),
        transcendentals=int(N * C),
        bytes_accessed=int(N * C * itemsize + N * 8 + C * 4
                           + num_tiles * 8 * 128 * 4),
    )
    # Scoped-VMEM limit sized to the part: leave headroom on 64 MiB/TC (v7x),
    # open it up on 128 MiB parts (v5e/v6e) so bigger tiles amortize the
    # ~0.35 us per-grid-step overhead.
    vmem_limit = 64 * 1024 * 1024 if vmem_bytes >= 96 * 1024 * 1024 \
        else 36 * 1024 * 1024
    cparams = pltpu.CompilerParams(
        dimension_semantics=("parallel",),                    # shard tiles across TCs
        vmem_limit_bytes=vmem_limit,
    )

    if weight is None:
        kernel = functools.partial(
            _dala_kernel_unweighted, n_rows=N, tile_rows=tm)
        in_specs = [x_spec, m_spec, t_spec]
        args = (x, m, t)
    else:
        # Gather per-sample weights in the wrapper (cheap N-element XLA gather)
        # so the kernel never touches the (1, C) weight vector.
        w_t = jnp.asarray(weight, jnp.float32)[t[:, 0]].reshape(N, 1)
        kernel = functools.partial(
            _dala_kernel_weighted, n_rows=N, tile_rows=tm)
        in_specs = [x_spec, m_spec, t_spec, pl.BlockSpec((tm, 1), lambda i: (i, 0))]
        args = (x, m, t, w_t)

    parts = pl.pallas_call(
        kernel,
        out_shape=out_shape,
        grid=(num_tiles,),
        in_specs=in_specs,
        out_specs=part_spec,
        compiler_params=cparams,
        cost_estimate=cost,
    )(*args)

    num = jnp.sum(parts[:, 0, 0])
    den = jnp.sum(parts[:, 0, 1])
    return num / den


def make_m_list(cls_num_list, cls_loss, d, tau=1.0):
    """Replicates DALA.__init__ margin construction (plain JAX glue)."""
    cls_num = jnp.asarray(cls_num_list, jnp.float32)
    cls_p = cls_num / jnp.sum(cls_num)
    cls_loss = jnp.asarray(cls_loss, jnp.float32)
    t = cls_p / (jnp.power(cls_loss, d) + 1e-05)
    return tau * jnp.log(t)  # (C,)


def _reference(x, target, m_list, weight=None):
    """Pure-JAX reference of F.cross_entropy(x + m_list, target, weight)."""
    logits = x.astype(jnp.float32) + jnp.asarray(m_list, jnp.float32).reshape(1, -1)
    logp = jax.nn.log_softmax(logits, axis=-1)
    nll = -jnp.take_along_axis(logp, target.reshape(-1, 1), axis=-1)[:, 0]
    if weight is None:
        return jnp.mean(nll)
    w = jnp.asarray(weight, jnp.float32)[target]
    return jnp.sum(nll * w) / jnp.sum(w)


if __name__ == "__main__":
    key = jax.random.PRNGKey(0)
    N, C = 8, 16  # batch of 8 samples, 16 classes

    k1, k2, k3, k4, k5, k6, k7, k8 = jax.random.split(key, 8)
    # Deterministic "long-tailed" class counts and per-class losses.
    cls_num_list = jnp.linspace(100.0, 5.0, C)
    cls_loss = jax.random.uniform(k1, (C,), jnp.float32, minval=0.5, maxval=2.0)
    m_list = make_m_list(cls_num_list, cls_loss, d=0.5, tau=1.0)

    x = jax.random.normal(k2, (N, C), jnp.float32)
    target = jax.random.randint(k3, (N,), 0, C, jnp.int32)

    # 1) unweighted (weight=None) path, single tiny tile.
    loss = jax.block_until_ready(dala_loss(x, target, m_list, weight=None))
    ref = _reference(x, target, m_list)
    assert jnp.allclose(loss, ref, rtol=1e-5, atol=1e-5), (loss, ref)

    # 2) weighted path (wrapper-side weight[target] gather).
    w = jax.random.uniform(k4, (C,), jnp.float32, minval=0.5, maxval=2.0)
    loss_w = jax.block_until_ready(dala_loss(x, target, m_list, weight=w))
    ref_w = _reference(x, target, m_list, weight=w)
    assert jnp.allclose(loss_w, ref_w, rtol=1e-5, atol=1e-5), (loss_w, ref_w)

    # 3) multi-tile grid with a ragged last tile (N=20, TM=8 -> 3 tiles).
    N2 = 20
    x2 = jax.random.normal(k5, (N2, C), jnp.float32)
    t2 = jax.random.randint(k6, (N2,), 0, C, jnp.int32)
    loss2 = jax.block_until_ready(dala_loss(x2, t2, m_list, weight=None, tile_rows=8))
    ref2 = _reference(x2, t2, m_list)
    assert jnp.allclose(loss2, ref2, rtol=1e-5, atol=1e-5), (loss2, ref2)

    # 4) auto tile picker: N=32 must split into >=2 tiles ("parallel" axis has
    #    work for both v7x TensorCores), bf16 inputs stay bf16 across the call.
    N3 = 32
    x3 = jax.random.normal(k7, (N3, C), jnp.float32).astype(jnp.bfloat16)
    t3 = jax.random.randint(k8, (N3,), 0, C, jnp.int32)
    loss3 = jax.block_until_ready(dala_loss(x3, t3, m_list, weight=w))
    ref3 = _reference(x3, t3, m_list, weight=w)
    assert jnp.allclose(loss3, ref3, rtol=1e-4, atol=1e-4), (loss3, ref3)

    print("KERNEL_OK")
</pallas_src>

<mosaic_0001>
module attributes {stable_mosaic.version = 11 : i64} {
  func.func @_dala_kernel_unweighted(%arg0: i32, %arg1: memref<8x16xf32, #tpu.memory_space<vmem>>, %arg2: memref<1x16xf32, #tpu.memory_space<vmem>>, %arg3: memref<8x1xi32, #tpu.memory_space<vmem>>, %arg4: memref<1x8x128xf32, #tpu.memory_space<vmem>>) attributes {dimension_semantics = [#tpu.dimension_semantics<parallel>], iteration_bounds = array<i64: 1>, scalar_prefetch = 0 : i64, scratch_operands = 0 : i64, tpu.core_type = #tpu.core_type<tc>, window_params = [{transform_indices = @transform_0, window_bounds = array<i64: 8, 16>}, {pipeline_mode = #tpu.pipeline_mode<synchronous>, transform_indices = @transform_1, window_bounds = array<i64: 1, 16>}, {transform_indices = @transform_2, window_bounds = array<i64: 8, 1>}, {transform_indices = @transform_3, window_bounds = array<i64: 1, 8, 128>}]} {
    %c0 = arith.constant 0 : index
    %c0_0 = arith.constant 0 : index
    %0 = vector.load %arg1[%c0, %c0_0] : memref<8x16xf32, #tpu.memory_space<vmem>>, vector<8x16xf32>
    %c0_1 = arith.constant 0 : index
    %c0_2 = arith.constant 0 : index
    %1 = vector.load %arg2[%c0_1, %c0_2] : memref<1x16xf32, #tpu.memory_space<vmem>>, vector<1x16xf32>
    %2 = vector.broadcast %1 : vector<1x16xf32> to vector<8x16xf32>
    %3 = arith.addf %0, %2 : vector<8x16xf32>
    %c0_3 = arith.constant 0 : index
    %c0_4 = arith.constant 0 : index
    %4 = vector.load %arg3[%c0_3, %c0_4] : memref<8x1xi32, #tpu.memory_space<vmem>>, vector<8x1xi32>
    %5 = tpu.iota {dimensions = array<i32: 1>} : vector<8x16xi32>
    %6 = vector.broadcast %4 : vector<8x1xi32> to vector<8x16xi32>
    %7 = arith.cmpi eq, %5, %6 : vector<8x16xi32>
    %cst = arith.constant 0.000000e+00 : f32
    %8 = vector.broadcast %cst : f32 to vector<8x16xf32>
    %9 = arith.select %7, %3, %8 : vector<8x16xi1>, vector<8x16xf32>
    %cst_5 = arith.constant dense<0.000000e+00> : vector<8xf32>
    %10 = vector.multi_reduction <add>, %9, %cst_5 [1] : vector<8x16xf32> to vector<8xf32>
    %11 = vector.shape_cast %10 : vector<8xf32> to vector<8x1xf32>
    %cst_6 = arith.constant dense<0xFF800000> : vector<8xf32>
    %12 = vector.multi_reduction <maximumf>, %3, %cst_6 [1] : vector<8x16xf32> to vector<8xf32>
    %13 = vector.shape_cast %12 : vector<8xf32> to vector<8x1xf32>
    %14 = vector.broadcast %13 : vector<8x1xf32> to vector<8x16xf32>
    %15 = arith.subf %3, %14 : vector<8x16xf32>
    %16 = math.exp %15 : vector<8x16xf32>
    %cst_7 = arith.constant dense<0.000000e+00> : vector<8xf32>
    %17 = vector.multi_reduction <add>, %16, %cst_7 [1] : vector<8x16xf32> to vector<8xf32>
    %18 = vector.shape_cast %17 : vector<8xf32> to vector<8x1xf32>
    %19 = math.log %18 : vector<8x1xf32>
    %20 = arith.addf %13, %19 : vector<8x1xf32>
    %21 = arith.subf %20, %11 : vector<8x1xf32>
    %c8_i32 = arith.constant 8 : i32
    %22 = arith.muli %arg0, %c8_i32 : i32
    %23 = tpu.iota {dimensions = array<i32: 0>} : vector<8x1xi32>
    %24 = vector.broadcast %22 : i32 to vector<8x1xi32>
    %25 = arith.addi %24, %23 : vector<8x1xi32>
    %c8_i32_8 = arith.constant 8 : i32
    %26 = vector.broadcast %c8_i32_8 : i32 to vector<8x1xi32>
    %27 = arith.cmpi slt, %25, %26 : vector<8x1xi32>
    %cst_9 = arith.constant 0.000000e+00 : f32
    %28 = vector.broadcast %cst_9 : f32 to vector<8x1xf32>
    %29 = arith.select %27, %21, %28 : vector<8x1xi1>, vector<8x1xf32>
    %30 = vector.shape_cast %29 : vector<8x1xf32> to vector<1x8x1xf32>
    %cst_10 = arith.constant dense<0.000000e+00> : vector<1xf32>
    %31 = vector.multi_reduction <add>, %30, %cst_10 [1, 2] : vector<1x8x1xf32> to vector<1xf32>
    %32 = vector.shape_cast %31 : vector<1xf32> to vector<1x1x1xf32>
    %33 = vector.extract %32[0, 0, 0] : f32 from vector<1x1x1xf32>
    %cst_11 = arith.constant 1.000000e+00 : f32
    %cst_12 = arith.constant 0.000000e+00 : f32
    %34 = vector.broadcast %cst_11 : f32 to vector<8x1xf32>
    %35 = vector.broadcast %cst_12 : f32 to vector<8x1xf32>
    %36 = arith.select %27, %34, %35 : vector<8x1xi1>, vector<8x1xf32>
    %37 = vector.shape_cast %36 : vector<8x1xf32> to vector<1x8x1xf32>
    %cst_13 = arith.constant dense<0.000000e+00> : vector<1xf32>
    %38 = vector.multi_reduction <add>, %37, %cst_13 [1, 2] : vector<1x8x1xf32> to vector<1xf32>
    %39 = vector.shape_cast %38 : vector<1xf32> to vector<1x1x1xf32>
    %40 = vector.extract %39[0, 0, 0] : f32 from vector<1x1x1xf32>
    %41 = tpu.iota {dimensions = array<i32: 1>} : vector<1x8x128xi32>
    %42 = tpu.iota {dimensions = array<i32: 2>} : vector<1x8x128xi32>
    %c0_i32 = arith.constant 0 : i32
    %43 = vector.broadcast %c0_i32 : i32 to vector<1x8x128xi32>
    %44 = arith.cmpi eq, %41, %43 : vector<1x8x128xi32>
    %c0_i32_14 = arith.constant 0 : i32
    %45 = vector.broadcast %c0_i32_14 : i32 to vector<1x8x128xi32>
    %46 = arith.cmpi eq, %42, %45 : vector<1x8x128xi32>
    %47 = arith.andi %44, %46 : vector<1x8x128xi1>
    %c0_i32_15 = arith.constant 0 : i32
    %48 = vector.broadcast %c0_i32_15 : i32 to vector<1x8x128xi32>
    %49 = arith.cmpi eq, %41, %48 : vector<1x8x128xi32>
    %c1_i32 = arith.constant 1 : i32
    %50 = vector.broadcast %c1_i32 : i32 to vector<1x8x128xi32>
    %51 = arith.cmpi eq, %42, %50 : vector<1x8x128xi32>
    %52 = arith.andi %49, %51 : vector<1x8x128xi1>
    %cst_16 = arith.constant 0.000000e+00 : f32
    %53 = vector.broadcast %40 : f32 to vector<1x8x128xf32>
    %54 = vector.broadcast %cst_16 : f32 to vector<1x8x128xf32>
    %55 = arith.select %52, %53, %54 : vector<1x8x128xi1>, vector<1x8x128xf32>
    %56 = vector.broadcast %33 : f32 to vector<1x8x128xf32>
    %57 = arith.select %47, %56, %55 : vector<1x8x128xi1>, vector<1x8x128xf32>
    %c0_17 = arith.constant 0 : index
    %c0_18 = arith.constant 0 : index
    %c0_19 = arith.constant 0 : index
    %58 = vector.load %arg4[%c0_17, %c0_18, %c0_19] : memref<1x8x128xf32, #tpu.memory_space<vmem>>, vector<1x8x128xf32>
    tpu.vector_store %arg4[%c0_17, %c0_18, %c0_19], %57 {strides = array<i32>} : memref<1x8x128xf32, #tpu.memory_space<vmem>>, vector<1x8x128xf32>,
    return
  }
  func.func @transform_0(%arg0: i32) -> (i32, i32) {
    %c0_i32 = arith.constant 0 : i32
    %c0_i32_0 = arith.constant 0 : i32
    return %arg0, %c0_i32 : i32, i32
  }
  func.func @transform_1(%arg0: i32) -> (i32, i32) {
    %c0_i32 = arith.constant 0 : i32
    %c0_i32_0 = arith.constant 0 : i32
    %c0_i32_1 = arith.constant 0 : i32
    return %c0_i32, %c0_i32_0 : i32, i32
  }
  func.func @transform_2(%arg0: i32) -> (i32, i32) {
    %c0_i32 = arith.constant 0 : i32
    %c0_i32_0 = arith.constant 0 : i32
    return %arg0, %c0_i32 : i32, i32
  }
  func.func @transform_3(%arg0: i32) -> (i32, i32, i32) {
    %c0_i32 = arith.constant 0 : i32
    %c0_i32_0 = arith.constant 0 : i32
    %c0_i32_1 = arith.constant 0 : i32
    return %arg0, %c0_i32, %c0_i32_0 : i32, i32, i32
  }
}

</mosaic_0001>

<bundles_post_ra>
// kernel: tpu_custom_call.1
= control target key start
LH: loop header
LB: loop body
LE: loop exit
PB: predicated region body
PF: predicated region fallthrough
CT: control target
= control target key end

     0   :  { %vm29_vm0 = vcmask 130048   ;;  %s178_s0 = inlined_call_operand.vmem [shape: f32[8,16], index: 0, kind: input, shape index: {}]   ;;  %s179_s1 = inlined_call_operand.vmem [shape: f32[1,16], index: 1, kind: input, shape index: {}]   ;;  %s180_s2 = inlined_call_operand.vmem [shape: s32[8,1], index: 2, kind: input, shape index: {}]   ;;  %s181_s3 = inlined_call_operand.hbm [shape: f32[1,8,128], index: 3, kind: output, shape index: {}]  }
   0x1   :  { %v15_v0 = vld [vmem:[%s178_s0] sm:$0xff] }
   0x2   :  { %v109_v1 = vld [vmem:[%s179_s1] ss:$0 sm:$0xff] }
   0x3   :  { %8 = vsyncpa [#allocation3], 0  ;;  %v20_v2 = vadd.f32 %v109_v1, %v15_v0  ;;  %v140_v3 = vmov 0   ;;  %v21_v5 = vld [vmem:[%s180_s2] sm:$0xff]  ;;  %v22_v11 = vlaneseq  ;;  %vm53_vm2 = vcmask 7168   ;;  %s142_s0 = smov [#allocation2]  }
   0x4   :  { %108 = vset.pattern.permute.xlu0 %v140_v3  ;;  %v141_v23 = vmov 0.0   ;;  %s90_s1 = sshll.u32 %s142_s0, 4  ;;  %s92_s20 = sshll.u32 %s181_s3, 4  ;;  %s91_s1 = int_to_ptr.vmem [resolvable:$true] %s90_s1  ;;  %s93_s20 = int_to_ptr.hbm [resolvable:$true] %s92_s20 }
   0x5   :  { %v33_v4 = vsel %vm29_vm0, %v20_v2, -inf  ;;  %v23_v12 = vand.u32 127, %v22_v11  ;;  %v65_v24 = vsel %vm53_vm2, 1.0, %v141_v23  ;;  %v48_v39 = vshrl.u32 %v22_v11, 7 }
   0x6   :  { %34 = vmax.xlane.f32.xlu0 %v33_v4 }
   0x7   :  { %vm75_vm3 = vcmp.eq.s32.totalorder %v48_v39, 0  ;;  %vm78_vm4 = vcmp.eq.s32.totalorder %v23_v12, 1  ;;  %vm76_vm5 = vcmp.eq.s32.totalorder %v23_v12, 0 }
   0x8   :  { %vm79_vm6 = vmand %vm75_vm3, %vm78_vm4 }
   0x9   :  { %vm77_vm7 = vmand %vm75_vm3, %vm76_vm5 }
  0x1a   :  { %25 = vperm.xlu0 %108, %v21_v5  }
  0x79   :  { %v35_v6 = vpop.xlane.xlu0 %34 }
  0x7a   :  { %v36_v7 = vsub.f32 %v20_v2, %v35_v6 }
  0x7c   :  { %v37_v8 = vmul.f32 1.442695, %v36_v7 }
  0x7e   :  { %110 = vpow2.f32 %v37_v8 }
  0x84   :  { %v111_v9 = vpop.eup %110 }
  0x85   :  { %v39_v10 = vsel %vm29_vm0, %v111_v9, 0.0 }
  0x86   :  { %40 = vadd.xlane.f32.xlu1 %v39_v10 }
  0x8c   :  { %v26_v13 = vpop.permute.xlu0 %25 }
  0x8d   :  { %vm27_vm1 = vcmp.eq.s32.totalorder %v23_v12, %v26_v13 }
  0x8e   :  { %v28_v14 = vsel %vm27_vm1, %v20_v2, 0.0 }
  0x8f   :  { %v30_v15 = vsel %vm29_vm0, %v28_v14, 0.0 }
  0x90   :  { %31 = vadd.xlane.f32.xlu1 %v30_v15 }
  0xf9   :  { %v41_v16 = vpop.xlane.xlu1 %40 }
  0xfa   :  { %112 = vlog2.f32 %v41_v16 }
 0x100   :  { %v113_v17 = vpop.eup %112 }
 0x101   :  { %v43_v18 = vmul.f32 0.6931472, %v113_v17 }
 0x103   :  { %v44_v19 = vadd.f32 %v43_v18, %v35_v6  ;;  %v32_v20 = vpop.xlane.xlu1 %31 }
 0x105   :  { %v45_v21 = vsub.f32 %v44_v19, %v32_v20 }
 0x107   :  { %v54_v22 = vsel %vm53_vm2, %v45_v21, 0.0 }
 0x108   :  { %55 = vadd.xlane.f32.xlu2 %v54_v22 }
 0x110   :  { %66 = vadd.xlane.f32.xlu2 %v65_v24 }
 0x17b   :  { %v56_v25 = vpop.xlane.xlu2 %55 }
 0x17c   :  { %v57_v26 = vrot.slane %v56_v25, 4 }
 0x17e   :  { %v58_v27 = vadd.f32 %v57_v26, %v56_v25 }
 0x180   :  { %v59_v28 = vrot.slane %v58_v27, 2 }
 0x182   :  { %v60_v29 = vadd.f32 %v59_v28, %v58_v27 }
 0x183   :  { %v67_v30 = vpop.xlane.xlu2 %66 }
 0x184   :  { %v68_v31 = vrot.slane %v67_v30, 4  ;;  %v61_v32 = vrot.slane %v60_v29, 1 }
 0x186   :  { %v69_v33 = vadd.f32 %v68_v31, %v67_v30  ;;  %v62_v34 = vadd.f32 %v61_v32, %v60_v29 }
 0x188   :  { %v70_v35 = vrot.slane %v69_v33, 2  ;;  %101 = vpush %v62_v34 }
 0x18a   :  { %v71_v36 = vadd.f32 %v70_v35, %v69_v33 }
 0x18c   :  { %v72_v37 = vrot.slane %v71_v36, 1 }
 0x18e   :  { %v73_v38 = vadd.f32 %v72_v37, %v71_v36 }
 0x190   :  { %103 = vpush %v73_v38 }
 0x1b9   :  { %s102_s2 = spop %101 }
 0x1ba   :  { %v82_v41 = vstv %s102_s2 }
 0x1c1   :  { %s104_s21 = spop %103 }
 0x1c2   :  { %v80_v40 = vstv %s104_s21 }
 0x1c3   :  { %v81_v42 = vsel %vm79_vm6, %v80_v40, 0.0 }
 0x1c4   :  { %v83_v43 = vsel %vm77_vm7, %v82_v41, %v81_v42 }
 0x1c5   :  { %84 = vst [vmem:[#allocation2] sm:$0xff] %v83_v43 }
 0x1c6   :  { %95 = dma.vmem_to_hbm [thread:$0]  %s91_s1, 128, %s93_s20, [#allocation3]  }
 0x1c7   :  { %138 = dma.done.wait [#allocation3], 128  }
 0x1c8   :  { %139 = vsyncadd [#allocation3], 4294967168 }
 0x1c9   :  { %100 = vsyncpa [#allocation3], 1 }

</bundles_post_ra>
